<compile_context>
chip_gen: v5e
topology: v5e:2x2
jax: 0.10.0
libtpu: 0.0.40
codegen_flags: <defaults>
</compile_context>

<pallas_src>
import jax
import jax.numpy as jnp
from jax.experimental import pallas as pl
from jax.experimental.pallas import tpu as pltpu


def _round_up(a, b):
    return -(-a // b) * b


def _sublane(dtype):
    # Second-minor VMEM tile size: 8 for 4-byte, 16 for 2-byte, 32 for 1-byte.
    return max(8, 32 // jnp.dtype(dtype).itemsize)


def _vmem_budget():
    """(pipeline_byte_budget, vmem_limit_bytes) keyed off the TPU generation."""
    phys = 128 * 1024 * 1024  # v5e / v6e physical VMEM per TensorCore
    try:
        phys = int(getattr(pltpu.get_tpu_info(), "vmem_capacity_bytes", phys))
    except Exception:
        pass
    # Request at most half of physical VMEM (64 MiB on v5e/v6e, 32 MiB on v7x)
    # and keep ~15% headroom under the requested limit for compiler scratch.
    limit = min(64 * 1024 * 1024, phys // 2)
    return int(limit * 0.85), limit


def _copy_block_kernel(x_ref, o_ref):
    # Lane-dense path: one full-width, unmasked copy per grid step.
    # x_ref: (Cb, Hb, Wo) ; o_ref: (Cb, 1, Hb, Wo); the input DMA did the stride.
    o_ref[:, 0, :, :] = x_ref[...]


def _split_slice_kernel(x_ref, o_ref):
    # General path (Wo not 128-aligned): static unrolled per-stripe VMEM copy.
    # x_ref: (Cb, Hb, W) ; o_ref: (Cb, split, Hb, Wo)
    split = o_ref.shape[1]
    wo = o_ref.shape[3]
    for j in range(split):
        o_ref[:, j, :, :] = x_ref[:, :, j * wo:(j + 1) * wo]


def channel_split(x, split: int):
    """Pallas TPU ChannelSplit: (N, C, H, W) -> (N, C*split, H, W//split)."""
    if x.ndim != 4:
        raise ValueError(f"expected 4-D NCHW input, got shape {x.shape}")
    N, C, H, W = x.shape
    s = int(split)
    if s < 1 or W % s != 0:
        raise ValueError(f"W={W} must be divisible by split={s}")
    if s == 1:
        return x  # identity: skip the HBM round-trip entirely

    Wo = W // s
    NC = N * C
    itemsize = jnp.dtype(x.dtype).itemsize
    sub = _sublane(x.dtype)
    budget, vmem_limit = _vmem_budget()
    lane_dense = (Wo % 128 == 0)

    x3 = x.reshape(NC, H, W)  # free row-major reshape

    # ---- Block planning with PADDED (VMEM-resident) sizes -------------------
    if lane_dense:
        def step_bytes(cb, hb):
            # 2x double-buffered (input block + output block), both lane-dense.
            return 4 * cb * _round_up(hb, sub) * Wo * itemsize
    else:
        in_row = _round_up(W, 128) * itemsize          # padded input row
        out_row = s * _round_up(Wo, 128) * itemsize    # padded output row (s stripes)

        def step_bytes(cb, hb):
            return 2 * cb * _round_up(hb, sub) * (in_row + out_row)

    if step_bytes(1, H) <= budget:
        Hb = H
        Cb = max(1, min(NC, budget // step_bytes(1, H)))
    else:
        # One plane per step is already too big: tile H in sublane multiples.
        Cb = 1
        per_row = step_bytes(1, sub) // sub
        rows = max(sub, (budget // max(1, per_row) // sub) * sub)
        Hb = min(H, rows)

    # Shard the fused N*C axis across >= 2 chunks (v7x has 2 TensorCores) and,
    # while per-step footprint stays comfortably multi-MiB, add a few more
    # steps for pipeline overlap.
    if NC >= 2:
        Cb = min(Cb, _round_up(NC, 2) // 2)
    extra_axes = (s if lane_dense else 1) * pl.cdiv(H, Hb)
    while (Cb > 1 and pl.cdiv(NC, Cb) * extra_axes < 8
           and step_bytes(Cb, Hb) > 4 * 1024 * 1024):
        Cb = max(1, Cb // 2)

    nc_chunks = pl.cdiv(NC, Cb)
    h_chunks = pl.cdiv(H, Hb)
    bytes_accessed = 2 * NC * H * W * itemsize

    # ---- Specs / kernel ------------------------------------------------------
    if lane_dense:
        grid = (nc_chunks, s, h_chunks)
        in_specs = [pl.BlockSpec((Cb, Hb, Wo), lambda i, j, h: (i, h, j))]
        out_specs = pl.BlockSpec((Cb, 1, Hb, Wo), lambda i, j, h: (i, j, h, 0))
        kernel = _copy_block_kernel
        dims = ("parallel", "parallel", "parallel")
    else:
        # TODO(synk): for very narrow Wo on v5e a manual-DMA scatter of each
        # width stripe straight to HBM would avoid the narrow-store pass.
        grid = (nc_chunks, h_chunks)
        in_specs = [pl.BlockSpec((Cb, Hb, W), lambda i, h: (i, h, 0))]
        out_specs = pl.BlockSpec((Cb, s, Hb, Wo), lambda i, h: (i, 0, h, 0))
        kernel = _split_slice_kernel
        dims = ("parallel", "parallel")

    out5 = pl.pallas_call(
        kernel,
        out_shape=jax.ShapeDtypeStruct((NC, s, H, Wo), x.dtype),
        grid_spec=pltpu.PrefetchScalarGridSpec(
            num_scalar_prefetch=0,
            grid=grid,
            in_specs=in_specs,
            out_specs=out_specs,
        ),
        compiler_params=pltpu.CompilerParams(
            dimension_semantics=dims,
            vmem_limit_bytes=vmem_limit,
        ),
        cost_estimate=pl.CostEstimate(
            flops=0,
            transcendentals=0,
            bytes_accessed=bytes_accessed,
        ),
    )(x3)

    # (NC, split, H, Wo) row-major == (N, C*split, H, Wo) row-major.
    return out5.reshape(N, C * s, H, Wo)


def _reference_channel_split(x, split: int):
    # Pure-JAX reference mirroring the PyTorch view/permute/reshape.
    N, C, H, W = x.shape
    y = x.reshape(N, C, H, split, W // split)
    y = jnp.transpose(y, (0, 1, 3, 2, 4))
    return y.reshape(N, C * split, H, W // split)


if __name__ == "__main__":
    key = jax.random.PRNGKey(0)
    N, C, H, split = 2, 4, 16, 2

    # 1) Narrow-Wo shape typical of the module (general Pallas path, Wo = 8).
    W = 16
    x = jax.random.normal(key, (N, C, H, W), dtype=jnp.float32)
    out = jax.block_until_ready(channel_split(x, split))
    ref = _reference_channel_split(x, split)
    assert out.shape == (N, C * split, H, W // split)
    assert out.dtype == x.dtype
    assert jnp.array_equal(out, ref), "fp32 narrow-Wo mismatch vs reference"

    # 2) Lane-dense shape (Wo = 128): exercises the grid-split fast path.
    Wl = 256
    xl = jax.random.normal(jax.random.PRNGKey(0), (N, C, H, Wl), dtype=jnp.float32)
    outl = jax.block_until_ready(channel_split(xl, split))
    refl = _reference_channel_split(xl, split)
    assert outl.shape == (N, C * split, H, Wl // split)
    assert jnp.array_equal(outl, refl), "fp32 lane-dense mismatch vs reference"

    # 3) bf16 (pure data movement; dtype preserved bit-exactly).
    xb = xl.astype(jnp.bfloat16)
    outb = jax.block_until_ready(channel_split(xb, split))
    refb = _reference_channel_split(xb, split)
    assert outb.dtype == jnp.bfloat16
    assert jnp.array_equal(outb.astype(jnp.float32),
                           refb.astype(jnp.float32)), "bf16 mismatch"

    # 4) split == 1 identity short-circuit.
    assert jnp.array_equal(channel_split(x, 1), x)

    print("KERNEL_OK")
</pallas_src>

<mosaic_0001>
module attributes {stable_mosaic.version = 11 : i64} {
  func.func @_split_slice_kernel(%arg0: i32, %arg1: i32, %arg2: memref<4x16x16xf32, #tpu.memory_space<vmem>>, %arg3: memref<4x2x16x8xf32, #tpu.memory_space<vmem>>) attributes {dimension_semantics = [#tpu.dimension_semantics<parallel>, #tpu.dimension_semantics<parallel>], iteration_bounds = array<i64: 2, 1>, scalar_prefetch = 0 : i64, scratch_operands = 0 : i64, tpu.core_type = #tpu.core_type<tc>, window_params = [{transform_indices = @transform_0, window_bounds = array<i64: 4, 16, 16>}, {transform_indices = @transform_1, window_bounds = array<i64: 4, 2, 16, 8>}]} {
    %c0 = arith.constant 0 : index
    %c0_0 = arith.constant 0 : index
    %c0_1 = arith.constant 0 : index
    %0 = vector.load %arg2[%c0, %c0_0, %c0_1] : memref<4x16x16xf32, #tpu.memory_space<vmem>>, vector<4x16x8xf32>
    %c0_2 = arith.constant 0 : index
    %c0_3 = arith.constant 0 : index
    %c0_4 = arith.constant 0 : index
    %c0_5 = arith.constant 0 : index
    %1 = vector.load %arg3[%c0_2, %c0_3, %c0_4, %c0_5] : memref<4x2x16x8xf32, #tpu.memory_space<vmem>>, vector<4x1x16x8xf32>
    %2 = vector.shape_cast %1 : vector<4x1x16x8xf32> to vector<4x16x8xf32>
    %3 = vector.shape_cast %0 : vector<4x16x8xf32> to vector<4x1x16x8xf32>
    tpu.vector_store %arg3[%c0_2, %c0_3, %c0_4, %c0_5], %3 {strides = array<i32>} : memref<4x2x16x8xf32, #tpu.memory_space<vmem>>, vector<4x1x16x8xf32>,
    %c0_6 = arith.constant 0 : index
    %c0_7 = arith.constant 0 : index
    %c8 = arith.constant 8 : index
    %4 = vector.load %arg2[%c0_6, %c0_7, %c8] : memref<4x16x16xf32, #tpu.memory_space<vmem>>, vector<4x16x8xf32>
    %c0_8 = arith.constant 0 : index
    %c1 = arith.constant 1 : index
    %c0_9 = arith.constant 0 : index
    %c0_10 = arith.constant 0 : index
    %5 = vector.load %arg3[%c0_8, %c1, %c0_9, %c0_10] : memref<4x2x16x8xf32, #tpu.memory_space<vmem>>, vector<4x1x16x8xf32>
    %6 = vector.shape_cast %5 : vector<4x1x16x8xf32> to vector<4x16x8xf32>
    %7 = vector.shape_cast %4 : vector<4x16x8xf32> to vector<4x1x16x8xf32>
    tpu.vector_store %arg3[%c0_8, %c1, %c0_9, %c0_10], %7 {strides = array<i32>} : memref<4x2x16x8xf32, #tpu.memory_space<vmem>>, vector<4x1x16x8xf32>,
    return
  }
  func.func @transform_0(%arg0: i32, %arg1: i32) -> (i32, i32, i32) {
    %c0_i32 = arith.constant 0 : i32
    %c0_i32_0 = arith.constant 0 : i32
    return %arg0, %arg1, %c0_i32 : i32, i32, i32
  }
  func.func @transform_1(%arg0: i32, %arg1: i32) -> (i32, i32, i32, i32) {
    %c0_i32 = arith.constant 0 : i32
    %c0_i32_0 = arith.constant 0 : i32
    %c0_i32_1 = arith.constant 0 : i32
    return %arg0, %c0_i32, %arg1, %c0_i32_0 : i32, i32, i32, i32
  }
}

</mosaic_0001>

<bundles_post_ra>
// kernel: tpu_custom_call.1
= control target key start
LH: loop header
LB: loop body
LE: loop exit
PB: predicated region body
PF: predicated region fallthrough
CT: control target
= control target key end

     0   :  { %6 = vsyncpa [#allocation3], 0  ;;  %s618_s0 = inlined_call_operand.hbm [shape: f32[8,16,16], index: 0, kind: input, shape index: {}]   ;;  %s619_s1 = inlined_call_operand.vmem [shape: f32[8,2,16,8], index: 1, kind: output, shape index: {}]  }
   0x1   :  { %8 = vsyncpa [#allocation3 + $0x1], 0  ;;  %s515_s6 = smov 0   ;;  %s517_s7 = smov 0  }
   0x2   :  { %s519_s8 = smov 0   ;;  %s521_s9 = smov 0  }
   0x3   :  { %s523_s10 = smov 0   ;;  %s525_s11 = smov 0  }
   0x4 LB: > { %s336_s12 = sadd.s32 4294967295, %s500_s11   ;;  %s26_s13 = sadd.s32 1, %s496_s10  ;;  %s500_s11 = sphi %s525_s11, %s14_s11   ;;  %s496_s10 = sphi %s523_s10, %s626_s10   ;;  %s492_s9 = sphi %s521_s9, %s625_s9   ;;  %s488_s8 = sphi %s519_s8, %s624_s8   ;;  %s484_s7 = sphi %s517_s7, %s623_s7   ;;  %s480_s6 = sphi %s515_s6, %s622_s6  }
   0x5   : > { %p28_p0 = scmp.ge.s32.totalorder %s26_s13, 2  ;;  %s35_s14 = sadd.s32 1, %s488_s8 }
   0x6   : > { %p42_p1 = scmp.ne.s32.totalorder %s488_s8, %s484_s7  ;;  %p43_p2 = scmp.eq.s32.totalorder %s500_s11, 0 }
   0x7   : > { %s628_s13 = smov (%p28_p0, %s26_s13), 0  ;;  %p48_p4 = scmp.ne.s32.totalorder %s484_s7, %s480_s6 }
   0x8   : > { %p551_p3 = por %p43_p2, %p42_p1  ;;  %s30_s16 = ssub.s32 %s496_s10, %s628_s13 }
   0x9   : > { %p49_p5 = scmp.eq.s32.totalorder %s336_s12, 0  ;;  %p33_p6 = scmp.eq.s32.totalorder %s30_s16, 0 }
   0xa   : > { %p368_p8 = scmp.lt.s32.totalorder %s500_s11, 2  ;;  %s100_s19 = sand.u32 1, %s488_s8  }
   0xb   : > { %p558_p7 = por %p49_p5, %p48_p4  ;;  %s360_s20 = sshll.u32 %s496_s10, 6 }
   0xc   : > { %s564_s18 = scalar_select %p33_p6, %s488_s8, %s35_s14  }
   0xd   : > { %s340_s21 = sshll.u32 %s100_s19, 6  ;;  %s112_s24 = scalar_lea.hbm %s618_s0, %s360_s20 }
   0xe   : > { %s113_s25 = sshll.u32 %s112_s24, 4  ;;  %s104_s26 = scalar_lea.vmem [#allocation2], %s340_s21  ;;  %s114_s25 = int_to_ptr.hbm [resolvable:$true] %s113_s25 }
   0xf   : > { %s115_s27 = sshll.u32 %s104_s26, 4  ;;  %p365_p9 = pnand %p368_p8, %p551_p3  ;;  %s116_s27 = int_to_ptr.vmem [resolvable:$true] %s115_s27 }
  0x10   : > { %p344_p10 = scmp.ge.s32.totalorder %s500_s11, 1  ;;  %p123_p11 = scmp.lt.s32.totalorder %s500_s11, 3 }
  0x11   : > { %s101_s28 = scalar_lea.sflag [#allocation3], %s100_s19  ;;  %s502_s29 = smov 128  }
  0x12   : > { %s503_s30 = smov 8   ;;  %p124_p12 = pnand %p344_p10, %p123_p11 }
  0x13   : > { %367 = dma.hbm_to_vmem [thread:$0]  (!%p365_p9), %s114_s25, 1024, %s116_s27, %s101_s28, %s502_s29, %s502_s29, %s503_s30  }
  0x14   : > { %127 = sbr.rel (%p124_p12) target bundleno = 160 (0xa0), region = 24  ;;  %s129_s2 = sand.u32 (!%p124_p12), 1, %s484_s7  }
  0x15   : > { %s345_s3 = sshll.u32 (!%p124_p12), %s129_s2, 6  ;;  %s130_s4 = scalar_lea.sflag (!%p124_p12), [#allocation3], %s129_s2 }
  0x16   : > { %s133_s5 = scalar_lea.vmem (!%p124_p12), [#allocation2], %s345_s3 }
  0x19   : > { %475 = dma.done.wait (%p558_p7), %s130_s4, 1024  }
  0x1a   : > { %477 = vsyncadd (%p558_p7), %s130_s4, 4294966272  ;;  %v191_v0 = vld [vmem:[%s133_s5 + $0x10] sm:$0xff]  ;;  %v189_v1 = vld [vmem:[%s133_s5] sm:$0xff]  ;;  %s504_s6 = smov 120   ;;  %s346_s12 = sshll.u32 %s492_s9, 2  ;;  %vm180_vm0 = vcmask 64512  }
  0x1b   : > { %209 = vrot.lane.b32.xlu1 %v191_v0, %s504_s6  ;;  %205 = vrot.lane.b32.xlu0 %v189_v1, %s504_s6  ;;  %v193_v2 = vld [vmem:[%s133_s5 + $0x20] sm:$0xff]  ;;  %v192_v3 = vld [vmem:[%s133_s5 + $0x18] sm:$0xff]  ;;  %p162_p13 = scmp.lt.s32.totalorder %s346_s12, 7 }
  0x1c   : > { %213 = vrot.lane.b32.xlu2 %v193_v2, %s504_s6  ;;  %v190_v4 = vld [vmem:[%s133_s5 + $0x8] sm:$0xff]  ;;  %v196_v6 = vld [vmem:[%s133_s5 + $0x38] sm:$0xff]  ;;  %v195_v7 = vld [vmem:[%s133_s5 + $0x30] sm:$0xff] }
  0x1d   : > { %v194_v5 = vld [vmem:[%s133_s5 + $0x28] sm:$0xff]  ;;  %s630_s12 = smov (!%p162_p13, %s346_s12), 7 }
  0x1e   : > { %s361_s14 = sshll.u32 %s630_s12, 5 }
  0x1f   : > { %s169_s17 = scalar_lea.vmem %s619_s1, %s361_s14 }
  0x20   : > { %181 = vst.msk [vmem:[%s169_s17] sm:$0xff] %vm180_vm0, %v189_v1 }
  0x21   : > { %182 = vst.msk [vmem:[%s169_s17 + $0x8] sm:$0xff] %vm180_vm0, %v190_v4 }
  0x22   : > { %183 = vst.msk [vmem:[%s169_s17 + $0x20] sm:$0xff] %vm180_vm0, %v191_v0 }
  0x23   : > { %211 = vrot.lane.b32.xlu1 %v192_v3, %s504_s6  ;;  %207 = vrot.lane.b32.xlu0 %v190_v4, %s504_s6  ;;  %184 = vst.msk [vmem:[%s169_s17 + $0x28] sm:$0xff] %vm180_vm0, %v192_v3 }
  0x24   : > { %215 = vrot.lane.b32.xlu2 %v194_v5, %s504_s6  ;;  %185 = vst.msk [vmem:[%s169_s17 + $0x40] sm:$0xff] %vm180_vm0, %v193_v2 }
  0x25   : > { %186 = vst.msk [vmem:[%s169_s17 + $0x48] sm:$0xff] %vm180_vm0, %v194_v5 }
  0x26   : > { %187 = vst.msk [vmem:[%s169_s17 + $0x60] sm:$0xff] %vm180_vm0, %v195_v7 }
  0x27   : > { %188 = vst.msk [vmem:[%s169_s17 + $0x68] sm:$0xff] %vm180_vm0, %v196_v6 }
  0x2b   : > { %219 = vrot.lane.b32.xlu1 %v196_v6, %s504_s6  ;;  %217 = vrot.lane.b32.xlu0 %v195_v7, %s504_s6 }
  0x76   : > { %v214_v8 = vpop.permute.xlu2 %213 }
  0x77   : > { %353 = vst.msk [vmem:[%s169_s17 + $0x50] sm:$0xff] %vm180_vm0, %v214_v8 }
  0x7e   : > { %v216_v11 = vpop.permute.xlu2 %215 }
  0x7f   : > { %354 = vst.msk [vmem:[%s169_s17 + $0x58] sm:$0xff] %vm180_vm0, %v216_v11 }
  0x8d   : > { %v210_v9 = vpop.permute.xlu1 %209  ;;  %v206_v10 = vpop.permute.xlu0 %205 }
  0x8e   : > { %349 = vst.msk [vmem:[%s169_s17 + $0x10] sm:$0xff] %vm180_vm0, %v206_v10 }
  0x8f   : > { %351 = vst.msk [vmem:[%s169_s17 + $0x30] sm:$0xff] %vm180_vm0, %v210_v9 }
  0x95   : > { %v212_v12 = vpop.permute.xlu1 %211  ;;  %v208_v13 = vpop.permute.xlu0 %207 }
  0x96   : > { %350 = vst.msk [vmem:[%s169_s17 + $0x18] sm:$0xff] %vm180_vm0, %v208_v13 }
  0x97   : > { %352 = vst.msk [vmem:[%s169_s17 + $0x38] sm:$0xff] %vm180_vm0, %v212_v12 }
  0x9d   : > { %v220_v14 = vpop.permute.xlu1 %219  ;;  %v218_v15 = vpop.permute.xlu0 %217 }
  0x9e   : > { %356 = vst.msk [vmem:[%s169_s17 + $0x78] sm:$0xff] %vm180_vm0, %v220_v14 }
  0x9f   : > { %355 = vst.msk [vmem:[%s169_s17 + $0x70] sm:$0xff] %vm180_vm0, %v218_v15 }
  0xa0 PF: > { %s14_s11 = sadd.s32 1, %s500_s11   ;;  %s622_s6 = smov %s484_s7 }
  0xa1   : > { %p11_p0 = scmp.ge.s32.totalorder %s14_s11, 4   ;;  %s623_s7 = smov %s488_s8 }
  0xa2   : > { %s624_s8 = smov %s564_s18  ;;  %s625_s9 = smov %s496_s10 }
  0xa3   : > { %s626_s10 = smov %s628_s13  ;;  %13 = sbr.rel (!%p11_p0) target bundleno = 4 (0x4), region = 65 }
  0xa8   :  { %271 = vsyncpa [#allocation3], 1 }
  0xa9   :  { %273 = vsyncpa [#allocation3 + $0x1], 1 }

</bundles_post_ra>
